<compile_context>
chip_gen: v5e
topology: v5e:2x2
jax: 0.10.0
libtpu: 0.0.40
codegen_flags: <defaults>
</compile_context>

<pallas_src>
import numpy as np
import jax
import jax.numpy as jnp
from jax import lax
from jax.experimental import pallas as pl
from jax.experimental.pallas import tpu as pltpu

# Model dims (small, consistent with the module's constructor signature).
N_HEAD, D_K, D_V, D_X, D_O = 2, 16, 16, 32, 32
N_TOK = 8
SCALE = float(np.power(D_K, 0.5))
G = N_TOK // N_HEAD  # query rows per merged output block

# Row permutation turning the contiguous head-merge reshape into contiguous
# slices:  O'[j*G + m] = O[m*N_HEAD + j]   (for N_TOK=8, N_HEAD=2: [0,2,4,6,1,3,5,7])
_MERGE_PERM = np.arange(N_TOK).reshape(G, N_HEAD).T.reshape(-1)
_PERM_MAT = np.eye(N_TOK, dtype=np.float32)[_MERGE_PERM]  # (N_TOK, N_TOK)


# ----------------------------- Pallas kernel --------------------------------

def _fused_self_attention_kernel(x_ref, w_ref, b_ref, wo_ref, bo_ref, p_ref,
                                 o_ref):
    """Entire SelfAttention forward in a single kernel invocation (no grid)."""
    x = x_ref[...]                                         # (N_TOK, D_X)
    # Single fused projection: [q_h0|q_h1|k_h0|k_h1|v_h0|v_h1] in one MXU push.
    qkv = jnp.dot(x, w_ref[...],
                  preferred_element_type=jnp.float32) + b_ref[...]   # (N_TOK, 96)
    k_base = N_HEAD * D_K
    v_base = k_base + N_HEAD * D_K
    inv_scale = 1.0 / SCALE

    head_blocks = []
    for h in range(N_HEAD):                                # unrolled, 2 heads
        q = qkv[:, h * D_K:(h + 1) * D_K]                           # (N_TOK, D_K)
        k = qkv[:, k_base + h * D_K:k_base + (h + 1) * D_K]         # (N_TOK, D_K)
        v = qkv[:, v_base + h * D_V:v_base + (h + 1) * D_V]         # (N_TOK, D_V)
        # scores (n_q, n_k) = q @ k^T / sqrt(d_k)
        s = lax.dot_general(q, k, (((1,), (1,)), ((), ())),
                            preferred_element_type=jnp.float32) * inv_scale
        # Reference: nn.Softmax(dim=1) on (n_head, n_q, n_k) -> softmax over the
        # QUERY axis == axis 0 of this per-head 2-D score matrix.
        m = jnp.max(s, axis=0, keepdims=True)
        e = jnp.exp(s - m)
        attn = e * pl.reciprocal(jnp.sum(e, axis=0, keepdims=True), approx=True)
        o_h = jnp.dot(attn, v, preferred_element_type=jnp.float32)  # (N_TOK, D_V)
        # Row reorder via constant permutation matrix (tiny MXU matmul), so the
        # contiguous head-merge reshape below becomes contiguous concats.
        o_hp = jnp.dot(p_ref[...], o_h, preferred_element_type=jnp.float32)
        head_blocks.append(
            jnp.concatenate([o_hp[j * G:(j + 1) * G, :] for j in range(N_HEAD)],
                            axis=1))                                 # (G, N_HEAD*D_V)
    # y == output.view(n_head, n_q, d_v).view(n_q, n_head*d_v) of the reference.
    y = jnp.concatenate(head_blocks, axis=0)                         # (N_TOK, N_HEAD*D_V)
    # fc_o and single lane-dense (N_TOK, D_O) store.
    o_ref[...] = (jnp.dot(y, wo_ref[...],
                          preferred_element_type=jnp.float32) + bo_ref[...])


# ------------------------------- Wrapper -------------------------------------

def self_attention_forward(x, params):
    n, d_x = x.shape
    assert (n, d_x) == (N_TOK, D_X)

    # Trace-time algebraic folding of the chained projections:
    #   q = (x @ wq) @ wfq + bfq == x @ (wq @ wfq) + bfq   (same for k, v)
    # and column-wise concatenation into one (D_X, 96) effective weight.
    w_eff = jnp.concatenate([params["wq"] @ params["wfq"],
                             params["wk"] @ params["wfk"],
                             params["wv"] @ params["wfv"]], axis=1)
    b_eff = jnp.concatenate([params["bfq"], params["bfk"],
                             params["bfv"]]).reshape(1, -1)
    pmat = jnp.asarray(_PERM_MAT)

    vmem = pl.BlockSpec(memory_space=pltpu.MemorySpace.VMEM)
    # NOTE: at this size (~KB working set) the whole problem fits in one tile;
    # no grid / megacore sharding — batch a leading grid axis if this module is
    # ever called for many token sets.
    return pl.pallas_call(
        _fused_self_attention_kernel,
        out_shape=jax.ShapeDtypeStruct((n, D_O), jnp.float32),
        in_specs=[vmem] * 6,
        out_specs=vmem,
    )(x, w_eff, b_eff, params["wo"], params["bo"].reshape(1, D_O), pmat)


# --------------------------- Params & reference ------------------------------

def init_params(key):
    """Deterministic synthetic init, mimicking uniform(-1/sqrt(fan), +...)."""
    ks = jax.random.split(key, 11)

    def u(k, shape, fan):
        stdv = 1.0 / np.sqrt(fan)
        return jax.random.uniform(k, shape, jnp.float32, -stdv, stdv)

    return {
        # SelfAttention parameters (d_x, d_k/d_v)
        "wq": u(ks[0], (D_X, D_K), D_K),
        "wk": u(ks[1], (D_X, D_K), D_K),
        "wv": u(ks[2], (D_X, D_V), D_V),
        # fc_q / fc_k / fc_v  (stored (in, out) == PyTorch weight transposed)
        "wfq": u(ks[3], (D_K, N_HEAD * D_K), D_K),
        "bfq": u(ks[4], (N_HEAD * D_K,), N_HEAD * D_K),
        "wfk": u(ks[5], (D_K, N_HEAD * D_K), D_K),
        "bfk": u(ks[6], (N_HEAD * D_K,), N_HEAD * D_K),
        "wfv": u(ks[7], (D_V, N_HEAD * D_V), D_V),
        "bfv": u(ks[8], (N_HEAD * D_V,), N_HEAD * D_V),
        # fc_o
        "wo": u(ks[9], (N_HEAD * D_V, D_O), N_HEAD * D_V),
        "bo": u(ks[10], (D_O,), D_O),
    }


def reference_forward(x, params):
    """Pure-JAX mirror of the PyTorch forward (for correctness check)."""
    q0 = x @ params["wq"]
    k0 = x @ params["wk"]
    v0 = x @ params["wv"]
    q = q0 @ params["wfq"] + params["bfq"]
    k = k0 @ params["wfk"] + params["bfk"]
    v = v0 @ params["wfv"] + params["bfv"]
    n = x.shape[0]
    q = q.reshape(n, N_HEAD, D_K).transpose(1, 0, 2)
    k = k.reshape(n, N_HEAD, D_K).transpose(1, 0, 2)
    v = v.reshape(n, N_HEAD, D_V).transpose(1, 0, 2)
    u = jnp.einsum("hqd,hkd->hqk", q, k) / SCALE
    attn = jax.nn.softmax(u, axis=1)          # dim=1 == query axis, as in ref
    o = jnp.einsum("hqk,hkd->hqd", attn, v)
    y = o.reshape(n, N_HEAD * D_V)            # raw contiguous reshape, as ref
    return y @ params["wo"] + params["bo"]


# ----------------------------------- Main ------------------------------------

if __name__ == "__main__":
    key = jax.random.PRNGKey(0)
    k_param, k_x = jax.random.split(key)
    params = init_params(k_param)
    x = jax.random.normal(k_x, (N_TOK, D_X), dtype=jnp.float32)

    fwd = jax.jit(self_attention_forward)
    out = jax.block_until_ready(fwd(x, params))

    ref = reference_forward(x, params)
    assert out.shape == (N_TOK, D_O)
    # Tolerance 2e-3: accounts for the EUP approximate reciprocal in the
    # softmax denominator and the trace-time weight folding (fp32 rounding).
    assert jnp.allclose(out, ref, rtol=2e-3, atol=2e-3), "mismatch vs reference"
    print("KERNEL_OK")
</pallas_src>

<mosaic_0001>
module attributes {stable_mosaic.version = 11 : i64} {
  func.func @_fused_self_attention_kernel(%arg0: memref<8x32xf32, #tpu.memory_space<vmem>>, %arg1: memref<32x96xf32, #tpu.memory_space<vmem>>, %arg2: memref<1x96xf32, #tpu.memory_space<vmem>>, %arg3: memref<32x32xf32, #tpu.memory_space<vmem>>, %arg4: memref<1x32xf32, #tpu.memory_space<vmem>>, %arg5: memref<8x8xf32, #tpu.memory_space<vmem>>, %arg6: memref<8x32xf32, #tpu.memory_space<vmem>>) attributes {dimension_semantics = [], scalar_prefetch = 0 : i64, scratch_operands = 0 : i64, tpu.core_type = #tpu.core_type<tc>} {
    %c0 = arith.constant 0 : index
    %c0_0 = arith.constant 0 : index
    %0 = vector.load %arg0[%c0, %c0_0] : memref<8x32xf32, #tpu.memory_space<vmem>>, vector<8x32xf32>
    %c0_1 = arith.constant 0 : index
    %c0_2 = arith.constant 0 : index
    %1 = vector.load %arg1[%c0_1, %c0_2] : memref<32x96xf32, #tpu.memory_space<vmem>>, vector<32x96xf32>
    %cst = arith.constant dense<0.000000e+00> : vector<8x96xf32>
    %2 = tpu.matmul %0, %1, %cst {dimension_numbers = #tpu.dot_dimension_numbers<[1], [0], [0], [1], [0, 0, 1, 1], [], []>} : vector<8x32xf32>, vector<32x96xf32>, vector<8x96xf32> -> vector<8x96xf32>
    %c0_3 = arith.constant 0 : index
    %c0_4 = arith.constant 0 : index
    %3 = vector.load %arg2[%c0_3, %c0_4] : memref<1x96xf32, #tpu.memory_space<vmem>>, vector<1x96xf32>
    %4 = vector.broadcast %3 : vector<1x96xf32> to vector<8x96xf32>
    %5 = arith.addf %2, %4 : vector<8x96xf32>
    %6 = vector.extract_strided_slice %5 {offsets = [0, 0], sizes = [8, 16], strides = [1, 1]} : vector<8x96xf32> to vector<8x16xf32>
    %7 = vector.extract_strided_slice %5 {offsets = [0, 32], sizes = [8, 16], strides = [1, 1]} : vector<8x96xf32> to vector<8x16xf32>
    %8 = vector.extract_strided_slice %5 {offsets = [0, 64], sizes = [8, 16], strides = [1, 1]} : vector<8x96xf32> to vector<8x16xf32>
    %cst_5 = arith.constant dense<0.000000e+00> : vector<8x8xf32>
    %9 = tpu.matmul %6, %7, %cst_5 {dimension_numbers = #tpu.dot_dimension_numbers<[1], [1], [0], [0], [0, 0, 1, 0], [], []>} : vector<8x16xf32>, vector<8x16xf32>, vector<8x8xf32> -> vector<8x8xf32>
    %cst_6 = arith.constant 2.500000e-01 : f32
    %10 = vector.broadcast %cst_6 : f32 to vector<8x8xf32>
    %11 = arith.mulf %9, %10 : vector<8x8xf32>
    %cst_7 = arith.constant dense<0xFF800000> : vector<8xf32>
    %12 = vector.multi_reduction <maximumf>, %11, %cst_7 [0] : vector<8x8xf32> to vector<8xf32>
    %13 = vector.shape_cast %12 : vector<8xf32> to vector<1x8xf32>
    %14 = vector.broadcast %13 : vector<1x8xf32> to vector<8x8xf32>
    %15 = arith.subf %11, %14 : vector<8x8xf32>
    %16 = math.exp %15 : vector<8x8xf32>
    %cst_8 = arith.constant dense<0.000000e+00> : vector<8xf32>
    %17 = vector.multi_reduction <add>, %16, %cst_8 [0] : vector<8x8xf32> to vector<8xf32>
    %18 = vector.shape_cast %17 : vector<8xf32> to vector<1x8xf32>
    %19 = tpu.reciprocal %18 {approx = true} : vector<1x8xf32> -> vector<1x8xf32>
    %20 = vector.broadcast %19 : vector<1x8xf32> to vector<8x8xf32>
    %21 = arith.mulf %16, %20 : vector<8x8xf32>
    %cst_9 = arith.constant dense<0.000000e+00> : vector<8x16xf32>
    %22 = tpu.matmul %21, %8, %cst_9 {dimension_numbers = #tpu.dot_dimension_numbers<[1], [0], [0], [1], [0, 0, 1, 1], [], []>} : vector<8x8xf32>, vector<8x16xf32>, vector<8x16xf32> -> vector<8x16xf32>
    %c0_10 = arith.constant 0 : index
    %c0_11 = arith.constant 0 : index
    %23 = vector.load %arg5[%c0_10, %c0_11] : memref<8x8xf32, #tpu.memory_space<vmem>>, vector<8x8xf32>
    %cst_12 = arith.constant dense<0.000000e+00> : vector<8x16xf32>
    %24 = tpu.matmul %23, %22, %cst_12 {dimension_numbers = #tpu.dot_dimension_numbers<[1], [0], [0], [1], [0, 0, 1, 1], [], []>} : vector<8x8xf32>, vector<8x16xf32>, vector<8x16xf32> -> vector<8x16xf32>
    %25 = vector.extract_strided_slice %24 {offsets = [0, 0], sizes = [4, 16], strides = [1, 1]} : vector<8x16xf32> to vector<4x16xf32>
    %26 = vector.extract_strided_slice %24 {offsets = [4, 0], sizes = [4, 16], strides = [1, 1]} : vector<8x16xf32> to vector<4x16xf32>
    %27 = tpu.concatenate %25, %26 in 1 : vector<4x16xf32>, vector<4x16xf32> -> vector<4x32xf32>
    %28 = vector.extract_strided_slice %5 {offsets = [0, 16], sizes = [8, 16], strides = [1, 1]} : vector<8x96xf32> to vector<8x16xf32>
    %29 = vector.extract_strided_slice %5 {offsets = [0, 48], sizes = [8, 16], strides = [1, 1]} : vector<8x96xf32> to vector<8x16xf32>
    %30 = vector.extract_strided_slice %5 {offsets = [0, 80], sizes = [8, 16], strides = [1, 1]} : vector<8x96xf32> to vector<8x16xf32>
    %cst_13 = arith.constant dense<0.000000e+00> : vector<8x8xf32>
    %31 = tpu.matmul %28, %29, %cst_13 {dimension_numbers = #tpu.dot_dimension_numbers<[1], [1], [0], [0], [0, 0, 1, 0], [], []>} : vector<8x16xf32>, vector<8x16xf32>, vector<8x8xf32> -> vector<8x8xf32>
    %cst_14 = arith.constant 2.500000e-01 : f32
    %32 = vector.broadcast %cst_14 : f32 to vector<8x8xf32>
    %33 = arith.mulf %31, %32 : vector<8x8xf32>
    %cst_15 = arith.constant dense<0xFF800000> : vector<8xf32>
    %34 = vector.multi_reduction <maximumf>, %33, %cst_15 [0] : vector<8x8xf32> to vector<8xf32>
    %35 = vector.shape_cast %34 : vector<8xf32> to vector<1x8xf32>
    %36 = vector.broadcast %35 : vector<1x8xf32> to vector<8x8xf32>
    %37 = arith.subf %33, %36 : vector<8x8xf32>
    %38 = math.exp %37 : vector<8x8xf32>
    %cst_16 = arith.constant dense<0.000000e+00> : vector<8xf32>
    %39 = vector.multi_reduction <add>, %38, %cst_16 [0] : vector<8x8xf32> to vector<8xf32>
    %40 = vector.shape_cast %39 : vector<8xf32> to vector<1x8xf32>
    %41 = tpu.reciprocal %40 {approx = true} : vector<1x8xf32> -> vector<1x8xf32>
    %42 = vector.broadcast %41 : vector<1x8xf32> to vector<8x8xf32>
    %43 = arith.mulf %38, %42 : vector<8x8xf32>
    %cst_17 = arith.constant dense<0.000000e+00> : vector<8x16xf32>
    %44 = tpu.matmul %43, %30, %cst_17 {dimension_numbers = #tpu.dot_dimension_numbers<[1], [0], [0], [1], [0, 0, 1, 1], [], []>} : vector<8x8xf32>, vector<8x16xf32>, vector<8x16xf32> -> vector<8x16xf32>
    %c0_18 = arith.constant 0 : index
    %c0_19 = arith.constant 0 : index
    %45 = vector.load %arg5[%c0_18, %c0_19] : memref<8x8xf32, #tpu.memory_space<vmem>>, vector<8x8xf32>
    %cst_20 = arith.constant dense<0.000000e+00> : vector<8x16xf32>
    %46 = tpu.matmul %45, %44, %cst_20 {dimension_numbers = #tpu.dot_dimension_numbers<[1], [0], [0], [1], [0, 0, 1, 1], [], []>} : vector<8x8xf32>, vector<8x16xf32>, vector<8x16xf32> -> vector<8x16xf32>
    %47 = vector.extract_strided_slice %46 {offsets = [0, 0], sizes = [4, 16], strides = [1, 1]} : vector<8x16xf32> to vector<4x16xf32>
    %48 = vector.extract_strided_slice %46 {offsets = [4, 0], sizes = [4, 16], strides = [1, 1]} : vector<8x16xf32> to vector<4x16xf32>
    %49 = tpu.concatenate %47, %48 in 1 : vector<4x16xf32>, vector<4x16xf32> -> vector<4x32xf32>
    %50 = tpu.concatenate %27, %49 in 0 : vector<4x32xf32>, vector<4x32xf32> -> vector<8x32xf32>
    %c0_21 = arith.constant 0 : index
    %c0_22 = arith.constant 0 : index
    %51 = vector.load %arg3[%c0_21, %c0_22] : memref<32x32xf32, #tpu.memory_space<vmem>>, vector<32x32xf32>
    %cst_23 = arith.constant dense<0.000000e+00> : vector<8x32xf32>
    %52 = tpu.matmul %50, %51, %cst_23 {dimension_numbers = #tpu.dot_dimension_numbers<[1], [0], [0], [1], [0, 0, 1, 1], [], []>} : vector<8x32xf32>, vector<32x32xf32>, vector<8x32xf32> -> vector<8x32xf32>
    %c0_24 = arith.constant 0 : index
    %c0_25 = arith.constant 0 : index
    %53 = vector.load %arg4[%c0_24, %c0_25] : memref<1x32xf32, #tpu.memory_space<vmem>>, vector<1x32xf32>
    %54 = vector.broadcast %53 : vector<1x32xf32> to vector<8x32xf32>
    %55 = arith.addf %52, %54 : vector<8x32xf32>
    %c0_26 = arith.constant 0 : index
    %c0_27 = arith.constant 0 : index
    %56 = vector.load %arg6[%c0_26, %c0_27] : memref<8x32xf32, #tpu.memory_space<vmem>>, vector<8x32xf32>
    tpu.vector_store %arg6[%c0_26, %c0_27], %55 {strides = array<i32>} : memref<8x32xf32, #tpu.memory_space<vmem>>, vector<8x32xf32>,
    return
  }
}

</mosaic_0001>

<bundles_post_ra>
// kernel: self_attention_forward.1
= control target key start
LH: loop header
LB: loop body
LE: loop exit
PB: predicated region body
PF: predicated region fallthrough
CT: control target
= control target key end

     0   :  { %s466_s0 = inlined_call_operand.vmem [shape: f32[8,32], index: 0, kind: input, shape index: {}]   ;;  %s467_s1 = inlined_call_operand.vmem [shape: f32[32,96], index: 1, kind: input, shape index: {}]   ;;  %s468_s2 = inlined_call_operand.vmem [shape: f32[1,96], index: 2, kind: input, shape index: {}]   ;;  %s469_s3 = inlined_call_operand.vmem [shape: f32[32,32], index: 3, kind: input, shape index: {}]   ;;  %s470_s4 = inlined_call_operand.vmem [shape: f32[1,32], index: 4, kind: input, shape index: {}]   ;;  %s471_s5 = inlined_call_operand.vmem [shape: f32[8,8], index: 5, kind: input, shape index: {}]   ;;  %s472_s6 = inlined_call_operand.hbm [shape: f32[8,32], index: 6, kind: output, shape index: {}]  }
   0x1   :  { %v28_v0 = vld [vmem:[%s467_s1 + $0x18] sm:$0xff]  ;;  %v27_v1 = vld [vmem:[%s467_s1 + $0x10] sm:$0xff]  ;;  %v26_v2 = vld [vmem:[%s467_s1 + $0x8] sm:$0xff] }
   0x2   :  { %49 = vmatpush.msra.mxu0 %v28_v0 }
   0x3   :  { %11 = vsyncpa [#allocation3], 0  ;;  %v25_v3 = vld [vmem:[%s467_s1] sm:$0xff]  ;;  %vm33_vm0 = vcmask 261120   ;;  %s368_s9 = smov 48   ;;  %s369_s10 = smov 80  }
   0x4   :  { %50 = vmatpush.msra.mxu0 %v27_v1  ;;  %v24_v4 = vld [vmem:[%s466_s0] sm:$0xff]  ;;  %s370_s1 = smov 96   ;;  %s371_s11 = smov 112   ;;  %vm60_vm1 = vcmask 130048   ;;  %vm86_vm2 = vcmask 64512   ;;  %v270_v60 = vld [vmem:[%s469_s3 + $0x18] sm:$0xff] }
   0x5   :  { %v332_v5 = vld [vmem:[%s468_s2] ss:$0 sm:$0xff]  ;;  %s372_s12 = smov 64   ;;  %v269_v61 = vld [vmem:[%s469_s3 + $0x10] sm:$0xff]  ;;  %v268_v0 = vld [vmem:[%s469_s3 + $0x8] sm:$0xff]  ;;  %vm265_vm3 = vcmask 1043456  }
   0x6   :  { %51 = vmatpush.msra.mxu0 %v26_v2  ;;  %v132_v33 = vld [vmem:[%s471_s5] sm:$0xff]  ;;  %s373_s5 = smov 16   ;;  %s374_s23 = smov [#allocation2]  }
   0x7   :  { %v267_v1 = vld [vmem:[%s469_s3] sm:$0xff]  ;;  %s304_s24 = sshll.u32 %s374_s23, 4  ;;  %s306_s26 = sshll.u32 %s472_s6, 4  ;;  %s305_s24 = int_to_ptr.vmem [resolvable:$true] %s304_s24  ;;  %s307_s26 = int_to_ptr.hbm [resolvable:$true] %s306_s26 }
   0x8   :  { %52 = vmatpush.msra.mxu0 %v25_v3 }
   0x9   :  { %315 = vmatmul.msk.f32.vlgmr.msra.gmra.mxu0 %vm33_vm0, %v24_v4 }
   0xa   :  { %290 = vmatpush.msrb.mxu0 %v270_v60 }
   0xc   :  { %291 = vmatpush.msrb.mxu0 %v269_v61 }
   0xe   :  { %292 = vmatpush.msrb.mxu0 %v268_v0 }
  0x10   :  { %293 = vmatpush.msrb.mxu0 %v267_v1 }
  0x86   :  { %v54_v6 = vpop.f32.mrf.mxu0 }
  0x87   :  { %v55_v7 = vadd.f32 %v332_v5, %v54_v6 }
  0x89   :  { %210 = vrot.lane.b32.xlu2 %v55_v7, %s368_s9  ;;  %164 = vrot.lane.b32.xlu1 %v55_v7, %s369_s10 }
  0x8a   :  { %58 = vrot.lane.b32.xlu0 %v55_v7, %s370_s1 }
  0x91   :  { %162 = vrot.lane.b32.xlu1 %v55_v7, %s371_s11 }
  0x92   :  { %106 = vrot.lane.b32.xlu0 %v55_v7, %s372_s12 }
  0xe3   :  { %v211_v35 = vpop.permute.xlu2 %210 }
  0xfb   :  { %v165_v10 = vpop.permute.xlu1 %164 }
  0xfc   :  { %v59_v8 = vpop.permute.xlu0 %58 }
  0xfd   :  { %316 = vmatpush.xpose.msk.msra.mxu1 %vm60_vm1, %v59_v8  ;;  %v333_v8 = vld [vmem:[%s470_s4] ss:$0 sm:$0xff] }
 0x100   :  { %317 = vmatmul.msk.f32.vlgmr.msra.gmra.mxu1 %vm60_vm1, %v55_v7 }
 0x103   :  { %v163_v32 = vpop.permute.xlu1 %162 }
 0x104   :  { %v107_v9 = vpop.permute.xlu0 %106 }
 0x105   :  { %127 = vmatpush.msra.mxu2 %v107_v9 }
 0x107   :  { %320 = vmatpush.xpose.msk.msrb.mxu2 %vm60_vm1, %v165_v10 }
 0x17d   :  { %v82_v11 = vpop.f32.mrf.mxu1 }
 0x17e   :  { %v85_v12 = vmul.f32 0.25, %v82_v11 }
 0x180   :  { %v87_v13 = vsel %vm86_vm2, %v85_v12, -inf }
 0x181   :  { %v88_v14 = vrot.slane %v87_v13, 4 }
 0x183   :  { %v89_v15 = vmax.f32 %v87_v13, %v88_v14 }
 0x185   :  { %v90_v16 = vrot.slane %v89_v15, 2 }
 0x187   :  { %v91_v17 = vmax.f32 %v89_v15, %v90_v16 }
 0x189   :  { %v92_v18 = vrot.slane %v91_v17, 1 }
 0x18b   :  { %v93_v19 = vmax.f32 %v91_v17, %v92_v18 }
 0x18d   :  { %v94_v20 = vsub.f32 %v85_v12, %v93_v19 }
 0x18f   :  { %v95_v21 = vmul.f32 1.442695, %v94_v20 }
 0x191   :  { %334 = vpow2.f32 %v95_v21 }
 0x197   :  { %v335_v22 = vpop.eup %334 }
 0x198   :  { %v97_v23 = vsel %vm86_vm2, %v335_v22, 0.0 }
 0x199   :  { %v98_v24 = vrot.slane %v97_v23, 4 }
 0x19b   :  { %v99_v25 = vadd.f32 %v98_v24, %v97_v23 }
 0x19d   :  { %v100_v26 = vrot.slane %v99_v25, 2 }
 0x19f   :  { %v101_v27 = vadd.f32 %v100_v26, %v99_v25 }
 0x1a1   :  { %v102_v28 = vrot.slane %v101_v27, 1 }
 0x1a3   :  { %v103_v29 = vadd.f32 %v102_v28, %v101_v27 }
 0x1a5   :  { %336 = vrcp.f32 %v103_v29 }
 0x1ab   :  { %v337_v30 = vpop.eup %336 }
 0x1ac   :  { %v105_v31 = vmul.f32 %v337_v30, %v335_v22 }
 0x1ae   :  { %318 = vmatmul.msk.f32.vlgmr.msra.gmra.mxu2 %vm86_vm2, %v105_v31 }
 0x1b6   :  { %321 = vmatmul.msk.f32.vlgmr.msrb.gmra.mxu2 %vm60_vm1, %v163_v32 }
 0x231   :  { %v129_v34 = vpop.f32.mrf.mxu2 }
 0x232   :  { %151 = vmatpush.msra.mxu3 %v129_v34 }
 0x233   :  { %319 = vmatmul.msk.f32.vlgmr.msra.gmra.mxu3 %vm86_vm2, %v132_v33 }
 0x234   :  { %231 = vmatpush.msrb.mxu3 %v211_v35 }
 0x239   :  { %v187_v36 = vpop.f32.mrf.mxu2 }
 0x23a   :  { %v190_v37 = vmul.f32 0.25, %v187_v36 }
 0x23c   :  { %v191_v38 = vsel %vm86_vm2, %v190_v37, -inf }
 0x23d   :  { %v192_v39 = vrot.slane %v191_v38, 4 }
 0x23f   :  { %v193_v40 = vmax.f32 %v191_v38, %v192_v39 }
 0x241   :  { %v194_v41 = vrot.slane %v193_v40, 2 }
 0x243   :  { %v195_v42 = vmax.f32 %v193_v40, %v194_v41 }
 0x245   :  { %v196_v43 = vrot.slane %v195_v42, 1 }
 0x247   :  { %v197_v44 = vmax.f32 %v195_v42, %v196_v43 }
 0x249   :  { %v198_v45 = vsub.f32 %v190_v37, %v197_v44 }
 0x24b   :  { %v199_v46 = vmul.f32 1.442695, %v198_v45 }
 0x24d   :  { %338 = vpow2.f32 %v199_v46 }
 0x253   :  { %v339_v47 = vpop.eup %338 }
 0x254   :  { %v201_v48 = vsel %vm86_vm2, %v339_v47, 0.0 }
 0x255   :  { %v202_v49 = vrot.slane %v201_v48, 4 }
 0x257   :  { %v203_v50 = vadd.f32 %v202_v49, %v201_v48 }
 0x259   :  { %v204_v51 = vrot.slane %v203_v50, 2 }
 0x25b   :  { %v205_v52 = vadd.f32 %v204_v51, %v203_v50 }
 0x25d   :  { %v206_v53 = vrot.slane %v205_v52, 1 }
 0x25f   :  { %v207_v54 = vadd.f32 %v206_v53, %v205_v52 }
 0x261   :  { %340 = vrcp.f32 %v207_v54 }
 0x267   :  { %v341_v55 = vpop.eup %340 }
 0x268   :  { %v209_v56 = vmul.f32 %v341_v55, %v339_v47 }
 0x26a   :  { %322 = vmatmul.msk.f32.vlgmr.msrb.gmra.mxu3 %vm86_vm2, %v209_v56 }
 0x2b6   :  { %v153_v57 = vpop.f32.mrf.mxu3 }
 0x2b7   :  { %v157_v58 = vrot.slane %v153_v57, 4 }
 0x2b9   :  { %158 = vrot.lane.b32.xlu0 %v157_v58, %s373_s5 }
 0x2ed   :  { %v233_v59 = vpop.f32.mrf.mxu3 }
 0x2ee   :  { %251 = vmatpush.msrb.mxu1 %v233_v59 }
 0x2ef   :  { %323 = vmatmul.msk.f32.vlgmr.msrb.gmra.mxu1 %vm86_vm2, %v132_v33 }
 0x32b   :  { %v159_v2 = vpop.permute.xlu0 %158 }
 0x32c   :  { %v161_v6 = vsel %vm60_vm1, %v153_v57, %v159_v2 }
 0x36c   :  { %v253_v62 = vpop.f32.mrf.mxu1 }
 0x36d   :  { %v257_v63 = vrot.slane %v253_v62, 4 }
 0x36f   :  { %258 = vrot.lane.b32.xlu2 %v257_v63, %s373_s5 }
 0x3c9   :  { %v259_v3 = vpop.permute.xlu2 %258 }
 0x3ca   :  { %v261_v4 = vsel %vm60_vm1, %v253_v62, %v259_v3 }
 0x3cb   :  { %v263_v5 = vrot.slane %v261_v4, 4 }
 0x3cd   :  { %v266_v7 = vsel %vm265_vm3, %v161_v6, %v263_v5 }
 0x3ce   :  { %324 = vmatmul.msk.f32.vlgmr.msrb.gmra.mxu0 %vm33_vm0, %v266_v7 }
 0x44b   :  { %v295_v9 = vpop.f32.mrf.mxu0 }
 0x44c   :  { %v296_v10 = vadd.f32 %v333_v8, %v295_v9 }
 0x44e   :  { %298 = vst.msk [vmem:[#allocation2] sm:$0xff] %vm33_vm0, %v296_v10 }
 0x44f   :  { %309 = dma.vmem_to_hbm [thread:$0]  %s305_s24, 128, %s307_s26, [#allocation3]  }
 0x450   :  { %366 = dma.done.wait [#allocation3], 128  }
 0x451   :  { %367 = vsyncadd [#allocation3], 4294967168 }
 0x452   :  { %314 = vsyncpa [#allocation3], 1 }

</bundles_post_ra>
